<compile_context>
chip_gen: v6e
topology: v6e:2x2x1
jax: 0.10.0
libtpu: 0.0.40
codegen_flags: <defaults>
</compile_context>

<pallas_src>
import jax
import jax.numpy as jnp
from jax.experimental import pallas as pl
from jax.experimental.pallas import tpu as pltpu


def _gcn_triple_kernel(a_ref, x_ref, w1t_ref, wcat_ref, alpha_ref,
                       pair_ref, triple_ref, oc_ref):
    """One (batch, row-tile) grid step.

    a_ref    : (N, N)                VMEM
    x_ref    : (N, Din)              VMEM
    w1t_ref  : (Din, H)              VMEM
    wcat_ref : (H, 2*Dout)           VMEM   [W2^T | W3^T]
    alpha_ref: (1,)                  SMEM   PReLU alpha
    pair_ref / triple_ref : (TI, N*2*Dout)  VMEM output blocks (lane-dense)
    oc_ref   : (N, 2*Dout)           VMEM scratch holding [out1 | out2]
    """
    n = a_ref.shape[0]
    row_tile = pair_ref.shape[0]
    two_dout = wcat_ref.shape[1]
    dout = two_dout // 2

    A = a_ref[...]                                               # (N, N)
    X = x_ref[...]                                               # (N, Din)

    # F = PReLU((A @ X) @ W1^T)
    ax = jnp.dot(A, X, preferred_element_type=jnp.float32)       # (N, Din)
    f = jnp.dot(ax, w1t_ref[...], preferred_element_type=jnp.float32)  # (N, H)
    alpha = alpha_ref[0]                                         # scalar from SMEM
    f = jnp.where(f > 0, f, alpha * f)                           # PReLU

    # Eval mode: F1 == F2 == F, so the second propagation is shared.
    h = jnp.dot(A, f, preferred_element_type=jnp.float32)        # (N, H)

    # Fused gcn_layer2 / gcn_layer3 projection: cols [:dout]=out1, [dout:]=out2.
    oc_ref[...] = jnp.dot(h, wcat_ref[...], preferred_element_type=jnp.float32)

    # Row tile of the pair outputs handled by this grid step.
    i0 = pl.multiple_of(pl.program_id(1) * row_tile, row_tile)
    oc_all = oc_ref[...]                                         # (N, 2*Dout)
    oc_tile = oc_ref[pl.ds(i0, row_tile), :]                     # (TI, 2*Dout)

    def slab(col_lo):
        # slab[i, j, :] = concat(out[j], out[i]) for the selected projection,
        # flattened to a lane-dense (TI, N*2*Dout) value and stored in one go.
        o_all = oc_all[:, col_lo:col_lo + dout]                  # (N, Dout)
        o_i = oc_tile[:, col_lo:col_lo + dout]                   # (TI, Dout)
        pj = jnp.broadcast_to(o_all[None, :, :], (row_tile, n, dout))
        pi = jnp.broadcast_to(o_i[:, None, :], (row_tile, n, dout))
        return jnp.concatenate([pj, pi], axis=-1).reshape(row_tile, n * two_dout)

    pair_ref[...] = slab(0)        # from gcn_layer2 output
    triple_ref[...] = slab(dout)   # from gcn_layer3 output


def _pick_row_tile(n, dout, budget_bytes=12 * 1024 * 1024):
    """Largest row tile (divisor of N, multiple of 8 or == N) whose two
    double-buffered f32 output blocks fit within `budget_bytes`."""
    bytes_per_row = n * 2 * dout * 4 * 2 * 2   # 2 outputs x 2 pipeline buffers
    max_rows = max(1, budget_bytes // bytes_per_row)
    best = None
    for d in range(1, n + 1):
        if n % d:
            continue
        if d != n and d % 8:
            continue   # keep the second-to-last block dim (8, .)-aligned
        if d <= max_rows:
            best = d
    if best is None:
        best = n       # nothing aligned fits the budget; fall back to full rows
    return best


def gcn_for_triple(A, X, w1, prelu_alpha, w2, w3,
                   *, vmem_limit_bytes=48 * 1024 * 1024):
    """A: (B,N,N), X: (B,N,Din); w1: (H,Din), w2/w3: (Dout,H) (PyTorch layout)."""
    A = jnp.asarray(A, jnp.float32)
    X = jnp.asarray(X, jnp.float32)
    B, N, Din = X.shape
    Hd = w1.shape[0]
    Dout = w2.shape[0]

    # Pre-transpose nn.Linear weights (x @ W^T) and fuse layer2/layer3.
    w1t = jnp.asarray(w1, jnp.float32).T                                   # (Din, H)
    wcat = jnp.concatenate([jnp.asarray(w2, jnp.float32).T,
                            jnp.asarray(w3, jnp.float32).T], axis=1)       # (H, 2*Dout)
    alpha = jnp.reshape(jnp.asarray(prelu_alpha, jnp.float32), (1,))       # SMEM scalar

    row_tile = _pick_row_tile(N, Dout)
    nt = N // row_tile
    row_elems = N * 2 * Dout   # lane-dense flattened last dim

    out_shape = (
        jax.ShapeDtypeStruct((B, N, row_elems), jnp.float32),
        jax.ShapeDtypeStruct((B, N, row_elems), jnp.float32),
    )

    pair_flat, triple_flat = pl.pallas_call(
        _gcn_triple_kernel,
        out_shape=out_shape,
        grid=(B, nt),
        in_specs=[
            pl.BlockSpec((None, N, N), lambda b, it: (b, 0, 0)),       # A[b]
            pl.BlockSpec((None, N, Din), lambda b, it: (b, 0, 0)),     # X[b]
            pl.BlockSpec((Din, Hd), lambda b, it: (0, 0)),             # W1^T
            pl.BlockSpec((Hd, 2 * Dout), lambda b, it: (0, 0)),        # [W2^T|W3^T]
            pl.BlockSpec(memory_space=pltpu.MemorySpace.SMEM),         # PReLU alpha
        ],
        out_specs=(
            pl.BlockSpec((None, row_tile, row_elems), lambda b, it: (b, it, 0)),
            pl.BlockSpec((None, row_tile, row_elems), lambda b, it: (b, it, 0)),
        ),
        scratch_shapes=[pltpu.VMEM((N, 2 * Dout), jnp.float32)],
        compiler_params=pltpu.CompilerParams(
            dimension_semantics=("parallel", "parallel"),
            vmem_limit_bytes=vmem_limit_bytes,
        ),
    )(A, X, w1t, wcat, alpha)

    # Free, contiguous reshape back to the module's 4-D layout.
    pair_text = pair_flat.reshape(B, N, N, 2 * Dout)
    triple_text = triple_flat.reshape(B, N, N, 2 * Dout)
    return pair_text, triple_text


def _reference(A, X, w1, alpha, w2, w3):
    # Plain-JAX reference matching the PyTorch forward (eval mode).
    F = jnp.einsum("bij,bjd->bid", A, X)
    F = F @ w1.T
    F = jnp.where(F > 0, F, alpha * F)
    H = jnp.einsum("bij,bjd->bid", A, F)
    o1 = H @ w2.T
    o2 = H @ w3.T

    def pair_gen(t):
        B, N, D = t.shape
        h1 = jnp.broadcast_to(t[:, None, :, :], (B, N, N, D))
        h2 = jnp.broadcast_to(t[:, :, None, :], (B, N, N, D))
        return jnp.concatenate([h1, h2], axis=-1)

    return pair_gen(o1), pair_gen(o2)


if __name__ == "__main__":
    # Small shapes consistent with the module.
    B, N = 2, 8
    input_dim, hidden_dim, out_dim = 16, 32, 16
    # class_num / p are unused in the returned tensors (eval mode).

    key = jax.random.PRNGKey(0)
    k_a, k_x, k_w1, k_w2, k_w3 = jax.random.split(key, 5)

    A = jax.random.uniform(k_a, (B, N, N), jnp.float32)
    A = A / jnp.sum(A, axis=-1, keepdims=True)   # row-normalized adjacency
    X = jax.random.normal(k_x, (B, N, input_dim), jnp.float32)

    # Deterministic synthetic parameters (PyTorch layout).
    w1 = jax.random.normal(k_w1, (hidden_dim, input_dim), jnp.float32) * 0.1
    w2 = jax.random.normal(k_w2, (out_dim, hidden_dim), jnp.float32) * 0.1
    w3 = jax.random.normal(k_w3, (out_dim, hidden_dim), jnp.float32) * 0.1
    prelu_alpha = jnp.float32(0.25)  # nn.PReLU default init

    pair_text, triple_text = gcn_for_triple(A, X, w1, prelu_alpha, w2, w3)
    jax.block_until_ready((pair_text, triple_text))

    ref_pair, ref_triple = _reference(A, X, w1, prelu_alpha, w2, w3)
    assert pair_text.shape == (B, N, N, 2 * out_dim)
    assert triple_text.shape == (B, N, N, 2 * out_dim)
    assert jnp.allclose(pair_text, ref_pair, atol=1e-5, rtol=1e-5)
    assert jnp.allclose(triple_text, ref_triple, atol=1e-5, rtol=1e-5)

    # TODO(synk): training-mode dropout (independent masks for the F1/F2
    # branches) could be added with pltpu.prng_seed/prng_random_bits; omitted
    # here since the forward is implemented in eval mode.
    print("KERNEL_OK")
</pallas_src>

<mosaic_0001>
module attributes {stable_mosaic.version = 11 : i64} {
  func.func @_gcn_triple_kernel(%arg0: i32, %arg1: i32, %arg2: memref<1x8x8xf32, #tpu.memory_space<vmem>>, %arg3: memref<1x8x16xf32, #tpu.memory_space<vmem>>, %arg4: memref<16x32xf32, #tpu.memory_space<vmem>>, %arg5: memref<32x32xf32, #tpu.memory_space<vmem>>, %arg6: memref<1xf32, #tpu.memory_space<smem>>, %arg7: memref<1x8x256xf32, #tpu.memory_space<vmem>>, %arg8: memref<1x8x256xf32, #tpu.memory_space<vmem>>, %arg9: memref<8x32xf32, #tpu.memory_space<vmem>>) attributes {dimension_semantics = [#tpu.dimension_semantics<parallel>, #tpu.dimension_semantics<parallel>], iteration_bounds = array<i64: 2, 1>, scalar_prefetch = 0 : i64, scratch_operands = 1 : i64, tpu.core_type = #tpu.core_type<tc>, window_params = [{transform_indices = @transform_0, window_bounds = array<i64: 1, 8, 8>}, {transform_indices = @transform_1, window_bounds = array<i64: 1, 8, 16>}, {pipeline_mode = #tpu.pipeline_mode<synchronous>, transform_indices = @transform_2, window_bounds = array<i64: 16, 32>}, {pipeline_mode = #tpu.pipeline_mode<synchronous>, transform_indices = @transform_3, window_bounds = array<i64: 32, 32>}, {transform_indices = @transform_4, window_bounds = array<i64: 1>}, {transform_indices = @transform_5, window_bounds = array<i64: 1, 8, 256>}, {transform_indices = @transform_6, window_bounds = array<i64: 1, 8, 256>}]} {
    %c0 = arith.constant 0 : index
    %c0_0 = arith.constant 0 : index
    %c0_1 = arith.constant 0 : index
    %0 = vector.load %arg2[%c0, %c0_0, %c0_1] : memref<1x8x8xf32, #tpu.memory_space<vmem>>, vector<1x8x8xf32>
    %1 = vector.shape_cast %0 : vector<1x8x8xf32> to vector<8x8xf32>
    %c0_2 = arith.constant 0 : index
    %c0_3 = arith.constant 0 : index
    %c0_4 = arith.constant 0 : index
    %2 = vector.load %arg3[%c0_2, %c0_3, %c0_4] : memref<1x8x16xf32, #tpu.memory_space<vmem>>, vector<1x8x16xf32>
    %3 = vector.shape_cast %2 : vector<1x8x16xf32> to vector<8x16xf32>
    %cst = arith.constant dense<0.000000e+00> : vector<8x16xf32>
    %4 = tpu.matmul %1, %3, %cst {dimension_numbers = #tpu.dot_dimension_numbers<[1], [0], [0], [1], [0, 0, 1, 1], [], []>} : vector<8x8xf32>, vector<8x16xf32>, vector<8x16xf32> -> vector<8x16xf32>
    %c0_5 = arith.constant 0 : index
    %c0_6 = arith.constant 0 : index
    %5 = vector.load %arg4[%c0_5, %c0_6] : memref<16x32xf32, #tpu.memory_space<vmem>>, vector<16x32xf32>
    %cst_7 = arith.constant dense<0.000000e+00> : vector<8x32xf32>
    %6 = tpu.matmul %4, %5, %cst_7 {dimension_numbers = #tpu.dot_dimension_numbers<[1], [0], [0], [1], [0, 0, 1, 1], [], []>} : vector<8x16xf32>, vector<16x32xf32>, vector<8x32xf32> -> vector<8x32xf32>
    %c0_8 = arith.constant 0 : index
    %7 = memref.load %arg6[%c0_8] : memref<1xf32, #tpu.memory_space<smem>>
    %cst_9 = arith.constant 0.000000e+00 : f32
    %8 = vector.broadcast %cst_9 : f32 to vector<8x32xf32>
    %9 = arith.cmpf ogt, %6, %8 : vector<8x32xf32>
    %10 = vector.broadcast %7 : f32 to vector<8x32xf32>
    %11 = arith.mulf %10, %6 : vector<8x32xf32>
    %12 = arith.select %9, %6, %11 : vector<8x32xi1>, vector<8x32xf32>
    %cst_10 = arith.constant dense<0.000000e+00> : vector<8x32xf32>
    %13 = tpu.matmul %1, %12, %cst_10 {dimension_numbers = #tpu.dot_dimension_numbers<[1], [0], [0], [1], [0, 0, 1, 1], [], []>} : vector<8x8xf32>, vector<8x32xf32>, vector<8x32xf32> -> vector<8x32xf32>
    %c0_11 = arith.constant 0 : index
    %c0_12 = arith.constant 0 : index
    %14 = vector.load %arg5[%c0_11, %c0_12] : memref<32x32xf32, #tpu.memory_space<vmem>>, vector<32x32xf32>
    %cst_13 = arith.constant dense<0.000000e+00> : vector<8x32xf32>
    %15 = tpu.matmul %13, %14, %cst_13 {dimension_numbers = #tpu.dot_dimension_numbers<[1], [0], [0], [1], [0, 0, 1, 1], [], []>} : vector<8x32xf32>, vector<32x32xf32>, vector<8x32xf32> -> vector<8x32xf32>
    %c0_14 = arith.constant 0 : index
    %c0_15 = arith.constant 0 : index
    %16 = vector.load %arg9[%c0_14, %c0_15] : memref<8x32xf32, #tpu.memory_space<vmem>>, vector<8x32xf32>
    tpu.vector_store %arg9[%c0_14, %c0_15], %15 {strides = array<i32>} : memref<8x32xf32, #tpu.memory_space<vmem>>, vector<8x32xf32>,
    %c8_i32 = arith.constant 8 : i32
    %17 = arith.muli %arg1, %c8_i32 : i32
    %18 = tpu.assume_multiple %17, 8 : i32
    %c0_16 = arith.constant 0 : index
    %c0_17 = arith.constant 0 : index
    %19 = vector.load %arg9[%c0_16, %c0_17] : memref<8x32xf32, #tpu.memory_space<vmem>>, vector<8x32xf32>
    %20 = arith.index_cast %18 : i32 to index
    %c0_18 = arith.constant 0 : index
    %21 = vector.load %arg9[%20, %c0_18] : memref<8x32xf32, #tpu.memory_space<vmem>>, vector<8x32xf32>
    %22 = vector.extract_strided_slice %19 {offsets = [0, 0], sizes = [8, 16], strides = [1, 1]} : vector<8x32xf32> to vector<8x16xf32>
    %23 = vector.extract_strided_slice %21 {offsets = [0, 0], sizes = [8, 16], strides = [1, 1]} : vector<8x32xf32> to vector<8x16xf32>
    %24 = vector.shape_cast %22 : vector<8x16xf32> to vector<1x8x16xf32>
    %25 = vector.shape_cast %24 : vector<1x8x16xf32> to vector<1x8x16xf32>
    %26 = vector.broadcast %25 : vector<1x8x16xf32> to vector<8x8x16xf32>
    %27 = vector.shape_cast %23 : vector<8x16xf32> to vector<8x1x16xf32>
    %28 = vector.shape_cast %27 : vector<8x1x16xf32> to vector<8x1x16xf32>
    %29 = vector.broadcast %28 : vector<8x1x16xf32> to vector<8x8x16xf32>
    %30 = tpu.concatenate %26, %29 in 2 : vector<8x8x16xf32>, vector<8x8x16xf32> -> vector<8x8x32xf32>
    %31 = vector.shape_cast %30 : vector<8x8x32xf32> to vector<8x256xf32>
    %c0_19 = arith.constant 0 : index
    %c0_20 = arith.constant 0 : index
    %c0_21 = arith.constant 0 : index
    %32 = vector.load %arg7[%c0_19, %c0_20, %c0_21] : memref<1x8x256xf32, #tpu.memory_space<vmem>>, vector<1x8x256xf32>
    %33 = vector.shape_cast %32 : vector<1x8x256xf32> to vector<8x256xf32>
    %34 = vector.shape_cast %31 : vector<8x256xf32> to vector<1x8x256xf32>
    tpu.vector_store %arg7[%c0_19, %c0_20, %c0_21], %34 {strides = array<i32>} : memref<1x8x256xf32, #tpu.memory_space<vmem>>, vector<1x8x256xf32>,
    %35 = vector.extract_strided_slice %19 {offsets = [0, 16], sizes = [8, 16], strides = [1, 1]} : vector<8x32xf32> to vector<8x16xf32>
    %36 = vector.extract_strided_slice %21 {offsets = [0, 16], sizes = [8, 16], strides = [1, 1]} : vector<8x32xf32> to vector<8x16xf32>
    %37 = vector.shape_cast %35 : vector<8x16xf32> to vector<1x8x16xf32>
    %38 = vector.shape_cast %37 : vector<1x8x16xf32> to vector<1x8x16xf32>
    %39 = vector.broadcast %38 : vector<1x8x16xf32> to vector<8x8x16xf32>
    %40 = vector.shape_cast %36 : vector<8x16xf32> to vector<8x1x16xf32>
    %41 = vector.shape_cast %40 : vector<8x1x16xf32> to vector<8x1x16xf32>
    %42 = vector.broadcast %41 : vector<8x1x16xf32> to vector<8x8x16xf32>
    %43 = tpu.concatenate %39, %42 in 2 : vector<8x8x16xf32>, vector<8x8x16xf32> -> vector<8x8x32xf32>
    %44 = vector.shape_cast %43 : vector<8x8x32xf32> to vector<8x256xf32>
    %c0_22 = arith.constant 0 : index
    %c0_23 = arith.constant 0 : index
    %c0_24 = arith.constant 0 : index
    %45 = vector.load %arg8[%c0_22, %c0_23, %c0_24] : memref<1x8x256xf32, #tpu.memory_space<vmem>>, vector<1x8x256xf32>
    %46 = vector.shape_cast %45 : vector<1x8x256xf32> to vector<8x256xf32>
    %47 = vector.shape_cast %44 : vector<8x256xf32> to vector<1x8x256xf32>
    tpu.vector_store %arg8[%c0_22, %c0_23, %c0_24], %47 {strides = array<i32>} : memref<1x8x256xf32, #tpu.memory_space<vmem>>, vector<1x8x256xf32>,
    return
  }
  func.func @transform_0(%arg0: i32, %arg1: i32) -> (i32, i32, i32) {
    %c0_i32 = arith.constant 0 : i32
    %c0_i32_0 = arith.constant 0 : i32
    %c0_i32_1 = arith.constant 0 : i32
    return %arg0, %c0_i32, %c0_i32_0 : i32, i32, i32
  }
  func.func @transform_1(%arg0: i32, %arg1: i32) -> (i32, i32, i32) {
    %c0_i32 = arith.constant 0 : i32
    %c0_i32_0 = arith.constant 0 : i32
    %c0_i32_1 = arith.constant 0 : i32
    return %arg0, %c0_i32, %c0_i32_0 : i32, i32, i32
  }
  func.func @transform_2(%arg0: i32, %arg1: i32) -> (i32, i32) {
    %c0_i32 = arith.constant 0 : i32
    %c0_i32_0 = arith.constant 0 : i32
    %c0_i32_1 = arith.constant 0 : i32
    return %c0_i32, %c0_i32_0 : i32, i32
  }
  func.func @transform_3(%arg0: i32, %arg1: i32) -> (i32, i32) {
    %c0_i32 = arith.constant 0 : i32
    %c0_i32_0 = arith.constant 0 : i32
    %c0_i32_1 = arith.constant 0 : i32
    return %c0_i32, %c0_i32_0 : i32, i32
  }
  func.func @transform_4(%arg0: i32, %arg1: i32) -> i32 {
    %c0_i32 = arith.constant 0 : i32
    %c0_i32_0 = arith.constant 0 : i32
    return %c0_i32 : i32
  }
  func.func @transform_5(%arg0: i32, %arg1: i32) -> (i32, i32, i32) {
    %c0_i32 = arith.constant 0 : i32
    %c0_i32_0 = arith.constant 0 : i32
    return %arg0, %arg1, %c0_i32 : i32, i32, i32
  }
  func.func @transform_6(%arg0: i32, %arg1: i32) -> (i32, i32, i32) {
    %c0_i32 = arith.constant 0 : i32
    %c0_i32_0 = arith.constant 0 : i32
    return %arg0, %arg1, %c0_i32 : i32, i32, i32
  }
}

</mosaic_0001>

<bundles_post_ra>
// kernel: tpu_custom_call.1
= control target key start
LH: loop header
LB: loop body
LE: loop exit
PB: predicated region body
PF: predicated region fallthrough
CT: control target
= control target key end

     0   :  { %s2171_s0 = inlined_call_operand.hbm [shape: f32[2,8,8], index: 0, kind: input, shape index: {}]   ;;  %s2172_s1 = inlined_call_operand.hbm [shape: f32[2,8,16], index: 1, kind: input, shape index: {}]   ;;  %s2173_s2 = inlined_call_operand.hbm [shape: f32[16,32], index: 2, kind: input, shape index: {}]   ;;  %s2174_s3 = inlined_call_operand.hbm [shape: f32[32,32], index: 3, kind: input, shape index: {}]   ;;  %s2175_s4 = inlined_call_operand.<no memory space> [shape: f32[1], index: 4, kind: input, shape index: {}]   ;;  %s2176_s5 = inlined_call_operand.hbm [shape: f32[2,8,256], index: 5, kind: output, shape index: {0}]   ;;  %s2177_s6 = inlined_call_operand.hbm [shape: f32[2,8,256], index: 6, kind: output, shape index: {1}]  }
   0x1   :  { %2179 = sst [smem:[#allocation21_spill]] %s2171_s0 }
   0x2   :  { %2180 = sst [smem:[#allocation22_spill]] %s2172_s1 }
   0x3   :  { %2181 = sst [smem:[#allocation23_spill]] %s2173_s2 }
   0x4   :  { %12 = sst [smem:[#allocation3]] %s2175_s4 }
   0x5   :  { %13 = vsyncpa [#allocation5], 0 }
   0x6   :  { %15 = vsyncpa [#allocation5 + $0x1], 0 }
   0x7   :  { %16 = vsyncpa [#allocation8], 0 }
   0x8   :  { %18 = vsyncpa [#allocation8 + $0x1], 0 }
   0x9   :  { %19 = vsyncpa [#allocation11], 0 }
   0xa   :  { %20 = vsyncpa [#allocation6], 0 }
   0xb   :  { %22 = vsyncpa [#allocation6 + $0x1], 0 }
   0xc   :  { %23 = vsyncpa [#allocation14], 0 }
   0xd   :  { %25 = vsyncpa [#allocation14 + $0x1], 0  ;;  %s1806_s23 = smov 0   ;;  %s1808_s24 = smov 0  }
   0xe   :  { %s1810_s25 = smov 0   ;;  %s1812_s26 = smov 0  }
   0xf   :  { %s1814_s27 = smov 0   ;;  %s1816_s4 = smov 0  }
  0x10 LB: > { %s1837_s28 = sadd.s32 4294967295, %s1748_s4   ;;  %s1342_s29 = sadd.s32 4294967294, %s1748_s4   ;;  %s1748_s4 = sphi %s1816_s4, %s31_s4   ;;  %s1744_s27 = sphi %s1814_s27, %s2202_s27   ;;  %s1740_s26 = sphi %s1812_s26, %s2201_s26   ;;  %s1736_s25 = sphi %s1810_s25, %s2200_s25   ;;  %s1732_s24 = sphi %s1808_s24, %s2199_s24   ;;  %s1728_s23 = sphi %s1806_s23, %s2198_s23  }
  0x11   : > { %p63_p0 = scmp.ne.s32.totalorder %s1732_s24, %s1728_s23  ;;  %p2178_p1 = scmp.eq.s32.totalorder %s1837_s28, 0 }
  0x12   : > { %p184_p3 = scmp.eq.s32.totalorder %s1342_s29, 1  ;;  %p1343_p5 = scmp.ge.s32.totalorder %s1748_s4, 1 }
  0x13   : > { %p1846_p4 = por %p2178_p1, %p63_p0  ;;  %p219_p7 = scmp.lt.s32.totalorder %s1748_s4, 3 }
  0x14   : > { %p1851_p6 = por %p184_p3, %p63_p0  ;;  %s1750_s9 = smov [#allocation9]  }
  0x15   : > { %p1856_p8 = pnand %p1343_p5, %p219_p7  ;;  %s231_s10 = sshll.u32 %s1750_s9, 4  ;;  %s232_s10 = int_to_ptr.vmem [resolvable:$true] %s231_s10 }
  0x16   : > { %s2183_s7 = scalar_select %p1851_p6, 1, 0 }
  0x17   : > { %p1428_p9 = pneg %p1856_p8  ;;  %s1751_s12 = smov [#allocation10]  }
  0x18   : > { %s244_s13 = sshll.u32 %s1751_s12, 4  ;;  %s1529_s14 = scalar_lea.vmem %s232_s10, 256  ;;  %s245_s13 = int_to_ptr.vmem [resolvable:$true] %s244_s13 }
  0x19   : > { %p1865_p11 = pnand %p1428_p9, %p2178_p1  ;;  %p1530_p13 = scmp.ne.s32.totalorder %s232_s10, %s1529_s14 }
  0x1a   : > { %p1537_p5 = scmp.lt.s32.totalorder %s232_s10, %s232_s10  ;;  %p1538_p7 = scmp.lt.s32.totalorder %s1529_s14, %s1529_s14 }
  0x1b   : > { %p1520_p12 = pneg %p1865_p11 }
  0x1c   : > { %p1539_p10 = por %p1538_p7, %p1537_p5 }
  0x1d   : > { %p1532_p0 = pnand %p1530_p13, %p1520_p12 }
  0x1f   : > { %p1533_p3 = pneg %p1532_p0 }
  0x21   : > { %p1540_p9 = pnand %p1539_p10, %p1533_p3 }
  0x23   : > { %1543 = shalt.err (!%p1540_p9)
}
  0x24   : > { %s1752_s15 = smov 128   ;;  %s1753_s16 = smov 8  }
  0x25   : > { %s2186_s2 = sld [smem:[#allocation23_spill]]  ;;  %s1555_s19 = scalar_lea.vmem %s245_s13, 512 }
  0x26   : > { %p1556_p1 = scmp.ne.s32.totalorder %s245_s13, %s1555_s19  ;;  %p1563_p2 = scmp.lt.s32.totalorder %s245_s13, %s245_s13 }
  0x27   : > { %p1564_p6 = scmp.lt.s32.totalorder %s1555_s19, %s1555_s19 }
  0x28   : > { %p1558_p13 = pnand %p1556_p1, %p1520_p12 }
  0x29   : > { %p1565_p5 = por %p1564_p6, %p1563_p2 }
  0x2a   : > { %p1559_p0 = pneg %p1558_p13 }
  0x2b   : > { %1431 = dma.hbm_to_vmem [thread:$0]  (!%p1865_p11), %s2186_s2, 256, %s232_s10, [#allocation8], %s1752_s15, %s1752_s15, %s1753_s16  }
  0x2c   : > { %p1566_p10 = pnand %p1565_p5, %p1559_p0 }
  0x2e   : > { %1569 = shalt.err (!%p1566_p10)
}
  0x2f   : > { %1434 = dma.hbm_to_vmem [thread:$0]  (!%p1865_p11), %s2174_s3, 512, %s245_s13, [#allocation11], %s1752_s15, %s1752_s15, %s1753_s16  }
  0x30   : > { %s43_s22 = sadd.s32 1, %s1744_s27  ;;  %s50_s29 = sadd.s32 1, %s1736_s25 }
  0x31   : > { %p45_p1 = scmp.ge.s32.totalorder %s43_s22, 2  ;;  %p57_p2 = scmp.ne.s32.totalorder %s1736_s25, %s1732_s24 }
  0x32   : > { %p58_p6 = scmp.eq.s32.totalorder %s1748_s4, 0  ;;  %p1451_p12 = scmp.lt.s32.totalorder %s1748_s4, 2 }
  0x33   : > { %s2204_s22 = smov (%p45_p1, %s43_s22), 0  ;;  %p2187_p7 = scmp.eq.s32.totalorder %s1837_s28, 1 }
  0x34   : > { %p59_p3 = por %p58_p6, %p57_p2  ;;  %s47_s10 = ssub.s32 %s1744_s27, %s2204_s22 }
  0x35   : > { %p1897_p9 = por %p2187_p7, %p57_p2  ;;  %s261_s11 = sand.u32 1, %s1736_s25  }
  0x36   : > { %p48_p13 = scmp.eq.s32.totalorder %s47_s10, 0  ;;  %s1347_s12 = sshll.u32 %s261_s11, 3 }
  0x37   : > { %s1348_s13 = sshll.u32 %s1744_s27, 7  ;;  %s2189_s0 = sld [smem:[#allocation21_spill]] }
  0x38   : > { %s1906_s14 = scalar_select %p48_p13, %s1736_s25, %s50_s29  }
  0x39   : > { %s265_s18 = scalar_lea.vmem [#allocation4], %s1347_s12  ;;  %p1913_p11 = pnand %p1451_p12, %p59_p3 }
  0x3a   : > { %s272_s19 = sshll.u32 %s265_s18, 4  ;;  %s2191_s1 = sld [smem:[#allocation22_spill]]  ;;  %s273_s19 = int_to_ptr.vmem [resolvable:$true] %s272_s19 }
  0x3b   : > { %s262_s29 = scalar_lea.sflag [#allocation5], %s261_s11  ;;  %p1572_p0 = pneg %p1913_p11 }
  0x3c   : > { %s1583_s15 = scalar_lea.vmem %s273_s19, 128  ;;  %s1754_s16 = smov [#allocation4]  }
  0x3d   : > { %s270_s17 = scalar_lea.hbm %s2189_s0, %s1348_s13  ;;  %p1584_p5 = scmp.ne.s32.totalorder %s273_s19, %s1583_s15 }
  0x3e   : > { %s1588_s18 = sshll.u32 %s1754_s16, 4  ;;  %s1589_s18 = int_to_ptr.vmem [resolvable:$false] %s1588_s18 }
  0x3f   : > { %p1586_p10 = pnand %p1584_p5, %p1572_p0  ;;  %s1590_s0 = scalar_lea.vmem %s1589_s18, 256 }
  0x40   : > { %s1920_s2 = scalar_lea.hbm %s2191_s1, %s1348_s13  ;;  %p1591_p2 = scmp.lt.s32.totalorder %s273_s19, %s1589_s18 }
  0x41   : > { %p1587_p1 = pneg %p1586_p10  ;;  %p1592_p6 = scmp.lt.s32.totalorder %s1590_s0, %s1583_s15 }
  0x43   : > { %p1593_p12 = por %p1592_p6, %p1591_p2 }
  0x45   : > { %p1594_p3 = pnand %p1593_p12, %p1587_p1 }
  0x47   : > { %1597 = shalt.err (!%p1594_p3)
}
  0x48   : > { %1438 = dma.hbm_to_vmem [thread:$0]  (!%p1913_p11), %s270_s17, 128, %s273_s19, %s262_s29  }
  0x49   : > { %s279_s11 = sand.u32 1, %s1748_s4   ;;  %s283_s13 = scalar_lea.vmem [#allocation7], %s1347_s12 }
  0x4a   : > { %s290_s21 = sshll.u32 %s283_s13, 4  ;;  %s280_s10 = scalar_lea.sflag [#allocation8], %s279_s11  ;;  %s291_s21 = int_to_ptr.vmem [resolvable:$true] %s290_s21 }
  0x4b   : > { %s1611_s1 = scalar_lea.vmem %s291_s21, 128  ;;  %s1755_s0 = smov [#allocation7]  }
  0x4c   : > { %p1612_p7 = scmp.ne.s32.totalorder %s291_s21, %s1611_s1  ;;  %s1616_s15 = sshll.u32 %s1755_s0, 4  ;;  %s1617_s15 = int_to_ptr.vmem [resolvable:$false] %s1616_s15 }
  0x4d   : > { %s1618_s16 = scalar_lea.vmem %s1617_s15, 256  ;;  %p1619_p10 = scmp.lt.s32.totalorder %s291_s21, %s1617_s15 }
  0x4e   : > { %p1614_p13 = pnand %p1612_p7, %p1572_p0  ;;  %p1620_p1 = scmp.lt.s32.totalorder %s1618_s16, %s1611_s1 }
  0x50   : > { %p1615_p5 = pneg %p1614_p13  ;;  %p1621_p2 = por %p1620_p1, %p1619_p10 }
  0x52   : > { %p1622_p6 = pnand %p1621_p2, %p1615_p5 }
  0x54   : > { %1625 = shalt.err (!%p1622_p6)
}
  0x55   : > { %1441 = dma.hbm_to_vmem [thread:$0]  (!%p1913_p11), %s1920_s2, 128, %s291_s21, %s280_s10  }
  0x56   : > { %299 = sbr.rel (%p1856_p8) target bundleno = 1208 (0x4b8), region = 40  ;;  %s1939_s12 = sand.u32 (!%p1856_p8), 1, %s1732_s24  }
  0x57   : > { %s1352_s17 = sshll.u32 (!%p1856_p8), %s1939_s12, 3  ;;  %s302_s19 = scalar_lea.sflag (!%p1856_p8), [#allocation5], %s1939_s12 }
  0x58   : > { %s305_s29 = scalar_lea.vmem (!%p1856_p8), [#allocation4], %s1352_s17 }
  0x5b   : > { %1703 = dma.done.wait (%p1846_p4), %s302_s19, 128  }
  0x5c   : > { %1705 = vsyncadd (%p1846_p4), %s302_s19, 4294967168  ;;  %s310_s1 = sand.u32 1, %s1837_s28   ;;  %s314_s8 = scalar_lea.vmem [#allocation7], %s1352_s17 }
  0x5d   : > { %s311_s2 = scalar_lea.sflag [#allocation8], %s310_s1 }
  0x5e   : > { %1707 = dma.done.wait (%p1846_p4), %s311_s2, 128  }
  0x5f   : > { %1709 = vsyncadd (%p1846_p4), %s311_s2, 4294967168  ;;  %p2192_p8 = scmp.eq.s32.totalorder %s1837_s28, 0 }
  0x61   : > { %1711 = dma.done.wait (%p2192_p8), [#allocation8], 256   ;;  %p2193_p11 = pmov %p2192_p8 }
  0x62   : > { %p2194_p0 = pmov %p2192_p8 }
  0x63   : > { %1713 = vsyncadd (%p2193_p11), [#allocation8], 4294967040 }
  0x64   : > { %1715 = dma.done.wait (%p2194_p0), [#allocation11], 512   ;;  %p2195_p12 = pmov %p2194_p0 }
  0x65   : > { %v1756_v0 = vmov 0.0   ;;  %vm1757_vm0 = vmmov 0   ;;  %vm363_vm1 = vcmask 64512   ;;  %v362_v1 = vld [vmem:[%s314_s8] sm:$0xff]  ;;  %v361_v2 = vld [vmem:[%s305_s29] sm:$0xff]  ;;  %vm439_vm2 = vcmask 130048  }
  0x66   : > { %1717 = vsyncadd (%p2195_p12), [#allocation11], 4294966784  ;;  %1384 = vmatprep.subr.mxu0 %v1756_v0  ;;  %1386 = vmatprep.mubr.msk.f32.mxu0 %vm1757_vm0, %v1756_v0  ;;  %v438_v3 = vld [vmem:[#allocation9 + $0x8] sm:$0xff]  ;;  %v437_v4 = vld [vmem:[#allocation9] sm:$0xff]  ;;  %s513_s28 = sld [smem:[#allocation3]]  ;;  %vm592_vm4 = vcmask 261120   ;;  %v676_v20 = vlaneseq }
  0x67   : > { %1401 = vmatprep.subr.mxu1 %v1756_v0  ;;  %1409 = vmatprep.mubr.msk.f32.mxu1 %vm1757_vm0, %v1756_v0  ;;  %v591_v7 = vld [vmem:[#allocation10 + $0x18] sm:$0xff]  ;;  %v590_v8 = vld [vmem:[#allocation10 + $0x10] sm:$0xff]  ;;  %v589_v9 = vld [vmem:[#allocation10 + $0x8] sm:$0xff]  ;;  %v1758_v18 = vmov 1966171168   ;;  %s1759_s30 = smov 16  }
  0x68   : > { %1385 = vmatpush3.msra.mxu0 %v362_v1  ;;  %1402 = vmatpush3.msra.mxu1 %v591_v7  ;;  %v588_v15 = vld [vmem:[#allocation10] sm:$0xff]  ;;  %v674_v19 = vunpack.c.l.s4 %v1758_v18  ;;  %v677_v23 = vshrl.u32 %v676_v20, 7  ;;  %s1760_s20 = smov 112   ;;  %v1761_v50 = vmov 1983009808   ;;  %s1763_s18 = smov 32  }
  0x69   : > { %1387 = vmatmul.mubr.msk.f32.vlgmr.msra.gmra.mxu0 %vm363_vm1, %v361_v2  ;;  %1389 = vmatprep.subr.mxu0 %v1756_v0  ;;  %v788_v51 = vunpack.c.l.s4 %v1761_v50  ;;  %v1762_v55 = vmov 1934713408   ;;  %s1764_s11 = smov 64   ;;  %s1765_s13 = smov 96   ;;  %vm948_vm5 = vcmask 785408   ;;  %vm946_vm6 = vcmask 523264  }
  0x6a   : > { %1390 = vmatpush3.msra.mxu0 %v438_v3  ;;  %1393 = vmatprep.mubr.msk.f32.mxu0 %vm1757_vm0, %v1756_v0  ;;  %v675_v22 = vunpack.c.0.s8 %v674_v19  ;;  %v723_v28 = vsub.s32 0, %v677_v23  ;;  %v852_v56 = vunpack.c.l.s4 %v1762_v55  ;;  %s1356_s21 = sshll.u32 %s1939_s12, 4  ;;  %s1370_s15 = sshll.u32 %s1740_s26, 8 }
  0x6b   : > { %1391 = vmatprep.subr.mxu0 %v1756_v0  ;;  %1403 = vmatprep.subr.mxu1 %v1756_v0  ;;  %v789_v54 = vunpack.c.0.s8 %v788_v51  ;;  %s353_s10 = scalar_lea.vmem [#allocation12], %s1356_s21  ;;  %s2073_s19 = scalar_lea.hbm %s2176_s5, %s1370_s15 }
  0x6c   : > { %1392 = vmatpush3.msra.mxu0 %v437_v4  ;;  %1404 = vmatpush3.msra.mxu1 %v590_v8  ;;  %v515_v10 = vstv %s513_s28  ;;  %v678_v25 = vsub.s32 %v675_v22, %v677_v23  ;;  %v853_v63 = vunpack.c.0.s8 %v852_v56  ;;  %s1165_s0 = sshll.u32 %s353_s10, 4  ;;  %s2078_s29 = scalar_lea.vmem [#allocation13], %s1356_s21  ;;  %s2075_s0 = int_to_ptr.vmem [resolvable:$true] %s1165_s0 }
  0x6d   : > { %1396 = vmatprep.subr.mxu0 %v1756_v0  ;;  %1405 = vmatprep.subr.mxu1 %v1756_v0  ;;  %v792_v62 = vsub.s32 %v789_v54, %v677_v23  ;;  %s1181_s1 = sshll.u32 %s2078_s29, 4  ;;  %s1144_s2 = scalar_lea.sflag [#allocation6], %s1939_s12  ;;  %s2122_s1 = int_to_ptr.vmem [resolvable:$true] %s1181_s1 }
  0x6e   : > { %1406 = vmatpush3.msra.mxu1 %v589_v9  ;;  %v1990_v8 = vsub.s32 %v853_v63, %v677_v23  ;;  %s1626_s8 = scalar_lea.vmem %s2075_s0, 256  ;;  %s1766_s28 = smov [#allocation12]  }
  0x6f   : > { %1407 = vmatprep.subr.mxu1 %v1756_v0  ;;  %p1627_p4 = scmp.ne.s32.totalorder %s2075_s0, %s1626_s8 }
  0x70   : > { %1408 = vmatpush3.msra.mxu1 %v588_v15 }
  0x71   : > { %p1628_p3 = pnand %p1627_p4, %p1897_p9 }
  0x73   : > { %p1629_p7 = pneg %p1628_p3 }
 0x129   : > { %v433_v5 = vpop.f32.mrf.mxu0 }
 0x12a   : > { %1394 = vmatmul.mubr.msk.f32.vlgmr.msra.gmra.mxu0 %vm439_vm2, %v433_v5 }
 0x12b   : > { %v1388_v6 = vpop.f32.mrf.mxu0  ;;  %1398 = vmatprep.mubr.msk.f32.mxu0 %vm1757_vm0, %v1756_v0 }
 0x1ea   : > { %v509_v11 = vpop.f32.mrf.mxu0 }
 0x1eb   : > { %vm514_vm3 = vcmp.gt.f32.partialorder %v509_v11, 0.0  ;;  %v516_v12 = vmul.f32 %v515_v10, %v509_v11 }
 0x1ec   : > { %v1395_v13 = vpop.f32.mrf.mxu0 }
 0x1ed   : > { %v517_v14 = vsel %vm514_vm3, %v509_v11, %v516_v12 }
 0x1ee   : > { %1397 = vmatpush3.msra.mxu0 %v517_v14 }
 0x1ef   : > { %1399 = vmatmul.mubr.msk.f32.vlgmr.msra.gmra.mxu0 %vm363_vm1, %v361_v2 }
 0x2af   : > { %v584_v16 = vpop.f32.mrf.mxu0 }
 0x2b0   : > { %1410 = vmatmul.mubr.msk.f32.vlgmr.msra.gmra.mxu1 %vm592_vm4, %v584_v16 }
 0x2b1   : > { %v1400_v17 = vpop.f32.mrf.mxu0 }
 0x370   : > { %v662_v21 = vpop.f32.mrf.mxu1 }
 0x371   : > { %666 = vst.msk [vmem:[#allocation2] sm:$0xff] %vm592_vm4, %v662_v21 }
 0x372   : > { %v1411_v24 = vpop.f32.mrf.mxu1 }
 0x378   : > { %v1969_v26 = vld [vmem:[#allocation2] sm:$0xff] }
 0x379   : > { %v679_v27 = vrot.slane %v1969_v26, %v678_v25  ;;  %v672_v29 = vcombine.high %v1969_v26, %v1969_v26 }
 0x37b   : > { %v695_v30 = vrot.slane %v679_v27, %v678_v25  ;;  %v687_v31 = vcombine.high %v679_v27, %v679_v27  ;;  %v686_v32 = vrot.slane %v672_v29, %v678_v25 }
 0x37d   : > { %v1974_v33 = vrot.slane %v695_v30, %v723_v28  ;;  %v717_v34 = vcombine.high %v695_v30, %v695_v30  ;;  %v709_v35 = vrot.slane %v687_v31, %v678_v25  ;;  %v688_v38 = vcombine.high %v686_v32, %v686_v32 }
 0x37e   : > { %v702_v40 = vrot.slane %v686_v32, %v678_v25 }
 0x37f   : > { %753 = vrot.lane.b32.xlu0 %v1974_v33, %s1759_s30  ;;  %v732_v36 = vrot.slane %v717_v34, %v723_v28  ;;  %v719_v37 = vcombine.high %v709_v35, %v709_v35  ;;  %v728_v39 = vrot.slane %v709_v35, %v723_v28  ;;  %v716_v42 = vrot.slane %v688_v38, %v678_v25 }
 0x380   : > { %v740_v43 = vrot.slane %v702_v40, %v723_v28  ;;  %v718_v44 = vcombine.high %v702_v40, %v702_v40 }
 0x381   : > { %757 = vrot.lane.b32.xlu1 %v732_v36, %s1759_s30  ;;  %v736_v41 = vrot.slane %v719_v37, %v723_v28  ;;  %v744_v45 = vrot.slane %v716_v42, %v723_v28  ;;  %v720_v46 = vcombine.high %v716_v42, %v716_v42 }
 0x382   : > { %v748_v47 = vrot.slane %v718_v44, %v723_v28 }
 0x383   : > { %755 = vrot.lane.b32.xlu0 %v728_v39, %s1759_s30  ;;  %v752_v48 = vrot.slane %v720_v46, %v723_v28 }
 0x385   : > { %759 = vrot.lane.b32.xlu1 %v736_v41, %s1759_s30 }
 0x387   : > { %761 = vrot.lane.b32.xlu0 %v740_v43, %s1759_s30 }
 0x389   : > { %763 = vrot.lane.b32.xlu1 %v744_v45, %s1759_s30 }
 0x38b   : > { %765 = vrot.lane.b32.xlu0 %v748_v47, %s1759_s30 }
 0x38d   : > { %767 = vrot.lane.b32.xlu1 %v752_v48, %s1759_s30  ;;  %s1630_s30 = sshll.u32 %s1766_s28, 4  ;;  %s1631_s30 = int_to_ptr.vmem [resolvable:$false] %s1630_s30 }
 0x38e   : > { %p1633_p13 = scmp.lt.s32.totalorder %s2075_s0, %s1631_s30 }
 0x38f   : > { %964 = vrot.lane.b32.xlu0 %v1969_v26, %s1760_s20  ;;  %s1632_s20 = scalar_lea.vmem %s1631_s30, 512 }
 0x390   : > { %p1634_p5 = scmp.lt.s32.totalorder %s1632_s20, %s1626_s8 }
 0x392   : > { %p1635_p10 = por %p1634_p5, %p1633_p13 }
 0x394   : > { %p1636_p1 = pnand %p1635_p10, %p1629_p7 }
 0x3f1   : > { %v754_v49 = vpop.permute.xlu0 %753 }
 0x3f2   : > { %v777_v60 = vsel %vm439_vm2, %v1969_v26, %v754_v49 }
 0x3f3   : > { %v758_v52 = vpop.permute.xlu1 %757 }
 0x3f4   : > { %v779_v58 = vsel %vm439_vm2, %v1969_v26, %v758_v52 }
 0x3f5   : > { %v756_v53 = vpop.permute.xlu0 %755  ;;  %v785_v0 = vcombine.low %v777_v60, %v779_v58  ;;  %v786_v2 = vcombine.high %v777_v60, %v779_v58 }
 0x3f6   : > { %v778_v3 = vsel %vm439_vm2, %v1969_v26, %v756_v53 }
 0x3f7   : > { %v760_v57 = vpop.permute.xlu1 %759  ;;  %v1992_v9 = vrot.slane %v785_v0, %v792_v62  ;;  %v1994_v12 = vrot.slane %v786_v2, %v792_v62 }
 0x3f8   : > { %v780_v61 = vsel %vm439_vm2, %v1969_v26, %v760_v57 }
 0x3f9   : > { %v762_v59 = vpop.permute.xlu0 %761  ;;  %v801_v4 = vcombine.low %v778_v3, %v780_v61  ;;  %v802_v13 = vcombine.high %v778_v3, %v780_v61 }
 0x3fa   : > { %v781_v6 = vsel %vm439_vm2, %v1969_v26, %v762_v59 }
 0x3fb   : > { %v764_v1 = vpop.permute.xlu1 %763  ;;  %v2000_v16 = vrot.slane %v801_v4, %v792_v62 }
 0x3fc   : > { %v782_v14 = vsel %vm439_vm2, %v1969_v26, %v764_v1 }
 0x3fd   : > { %v766_v5 = vpop.permute.xlu0 %765  ;;  %v849_v61 = vcombine.low %v1992_v9, %v2000_v16 }
 0x3fe   : > { %v783_v7 = vsel %vm439_vm2, %v1969_v26, %v766_v5 }
 0x3ff   : > { %v817_v10 = vcombine.low %v781_v6, %v783_v7  ;;  %v768_v11 = vpop.permute.xlu1 %767  ;;  %v818_v17 = vcombine.high %v781_v6, %v783_v7 }
 0x400   : > { %v784_v15 = vsel %vm439_vm2, %v1969_v26, %v768_v11 }
 0x401   : > { %v833_v18 = vcombine.low %v782_v14, %v784_v15  ;;  %v834_v19 = vcombine.high %v782_v14, %v784_v15  ;;  %v965_v20 = vpop.permute.xlu0 %964  ;;  %v2007_v25 = vrot.slane %v817_v10, %v792_v62  ;;  %v832_v34 = vrot.slane %v818_v17, %v792_v62 }
 0x402   : > { %v967_v21 = vsel %vm439_vm2, %v965_v20, %v1974_v33  ;;  %v968_v22 = vsel %vm439_vm2, %v965_v20, %v728_v39  ;;  %v969_v23 = vsel %vm439_vm2, %v965_v20, %v732_v36  ;;  %v970_v24 = vsel %vm439_vm2, %v965_v20, %v736_v41 }
 0x403   : > { %v2009_v27 = vrot.slane %v833_v18, %v792_v62  ;;  %v971_v26 = vsel %vm439_vm2, %v965_v20, %v740_v43  ;;  %v972_v28 = vsel %vm439_vm2, %v965_v20, %v744_v45  ;;  %v973_v29 = vsel %vm439_vm2, %v965_v20, %v748_v47 }
 0x404   : > { %v974_v30 = vsel %vm439_vm2, %v965_v20, %v752_v48  ;;  %v976_v31 = vcombine.high %v967_v21, %v969_v23  ;;  %v992_v32 = vcombine.high %v968_v22, %v970_v24  ;;  %v2015_v33 = vrot.slane %v802_v13, %v792_v62 }
 0x405   : > { %v848_v35 = vrot.slane %v834_v19, %v792_v62  ;;  %v881_v36 = vcombine.low %v2007_v25, %v2009_v27  ;;  %v1008_v39 = vcombine.high %v971_v26, %v973_v29  ;;  %v1024_v40 = vcombine.high %v972_v28, %v974_v30 }
 0x406   : > { %v990_v37 = vrot.slane %v976_v31, %v792_v62  ;;  %v1006_v38 = vrot.slane %v992_v32, %v792_v62  ;;  %v975_v41 = vcombine.low %v967_v21, %v969_v23  ;;  %v991_v42 = vcombine.low %v968_v22, %v970_v24 }
 0x407   : > { %v1007_v43 = vcombine.low %v971_v26, %v973_v29  ;;  %v1023_v44 = vcombine.low %v972_v28, %v974_v30  ;;  %v1022_v45 = vrot.slane %v1008_v39, %v792_v62  ;;  %v1038_v46 = vrot.slane %v1024_v40, %v792_v62 }
 0x408   : > { %v1055_v47 = vcombine.low %v990_v37, %v1006_v38  ;;  %v1056_v48 = vcombine.high %v990_v37, %v1006_v38  ;;  %v983_v49 = vrot.slane %v975_v41, %v792_v62  ;;  %v999_v50 = vrot.slane %v991_v42, %v792_v62 }
 0x409   : > { %v1015_v51 = vrot.slane %v1007_v43, %v792_v62  ;;  %v1031_v52 = vrot.slane %v1023_v44, %v792_v62  ;;  %v897_v53 = vcombine.low %v832_v34, %v848_v35  ;;  %v1087_v55 = vcombine.low %v1022_v45, %v1038_v46 }
 0x40a   : > { %v2020_v54 = vrot.slane %v1055_v47, %v1990_v8  ;;  %v1088_v56 = vcombine.high %v1022_v45, %v1038_v46  ;;  %v1039_v57 = vcombine.low %v983_v49, %v999_v50  ;;  %v1040_v59 = vcombine.high %v983_v49, %v999_v50 }
 0x40b   : > { %v1071_v58 = vcombine.low %v1015_v51, %v1031_v52  ;;  %v1072_v60 = vcombine.high %v1015_v51, %v1031_v52  ;;  %v865_v63 = vcombine.low %v1994_v12, %v2015_v33  ;;  %v2027_v0 = vrot.slane %v1087_v55, %v1990_v8 }
 0x40c   : > { %v2030_v62 = vrot.slane %v1039_v57, %v1990_v8  ;;  %v1070_v2 = vrot.slane %v1056_v48, %v1990_v8  ;;  %v1102_v4 = vrot.slane %v1088_v56, %v1990_v8  ;;  %v905_v5 = vrot.slane %v897_v53, %v1990_v8 }
 0x40d   : > { %v2033_v1 = vrot.slane %v1071_v58, %v1990_v8  ;;  %v1108_v3 = vcombine.high %v2020_v54, %v2027_v0  ;;  %v889_v6 = vrot.slane %v881_v36, %v1990_v8  ;;  %v1054_v10 = vrot.slane %v1040_v59, %v1990_v8 }
 0x40e   : > { %v1086_v11 = vrot.slane %v1072_v60, %v1990_v8  ;;  %v873_v13 = vrot.slane %v865_v63, %v1990_v8  ;;  %v857_v14 = vrot.slane %v849_v61, %v1990_v8  ;;  %v1107_v15 = vcombine.low %v2020_v54, %v2027_v0 }
 0x40f   : > { %v1104_v7 = vcombine.high %v2030_v62, %v2033_v1  ;;  %1124 = vrot.lane.b32.xlu0 %v1108_v3, %s1763_s18  ;;  %v1103_v17 = vcombine.low %v2030_v62, %v2033_v1  ;;  %v898_v18 = vcombine.high %v832_v34, %v848_v35  ;;  %v1109_v19 = vcombine.low %v1070_v2, %v1102_v4 }
 0x410   : > { %v917_v20 = vcombine.low %v873_v13, %v905_v5  ;;  %v913_v21 = vcombine.low %v857_v14, %v889_v6  ;;  %v882_v22 = vcombine.high %v2007_v25, %v2009_v27  ;;  %v1105_v23 = vcombine.low %v1054_v10, %v1086_v11 }
 0x411   : > { %1112 = vrot.lane.b32.xlu1 %v1104_v7, %s1763_s18  ;;  %v866_v24 = vcombine.high %v1994_v12, %v2015_v33  ;;  %v850_v26 = vcombine.high %v1992_v9, %v2000_v16  ;;  %v918_v28 = vcombine.high %v873_v13, %v905_v5  ;;  %v912_v29 = vrot.slane %v898_v18, %v1990_v8 }
 0x412   : > { %v914_v30 = vcombine.high %v857_v14, %v889_v6  ;;  %v896_v31 = vrot.slane %v882_v22, %v1990_v8  ;;  %v1110_v16 = vcombine.high %v1070_v2, %v1102_v4  ;;  %v1106_v34 = vcombine.high %v1054_v10, %v1086_v11 }
 0x413   : > { %1128 = vrot.lane.b32.xlu0 %v1109_v19, %s1764_s11  ;;  %v880_v32 = vrot.slane %v866_v24, %v1990_v8  ;;  %v864_v25 = vrot.slane %v850_v26, %v1990_v8 }
 0x415   : > { %1116 = vrot.lane.b32.xlu1 %v1105_v23, %s1764_s11  ;;  %v919_v27 = vcombine.low %v880_v32, %v912_v29  ;;  %v915_v12 = vcombine.low %v864_v25, %v896_v31  ;;  %v920_v33 = vcombine.high %v880_v32, %v912_v29  ;;  %v916_v9 = vcombine.high %v864_v25, %v896_v31 }
 0x417   : > { %934 = vrot.lane.b32.xlu0 %v918_v28, %s1763_s18 }
 0x419   : > { %922 = vrot.lane.b32.xlu1 %v914_v30, %s1763_s18 }
 0x41b   : > { %938 = vrot.lane.b32.xlu0 %v919_v27, %s1764_s11 }
 0x41d   : > { %926 = vrot.lane.b32.xlu1 %v915_v12, %s1764_s11 }
 0x41f   : > { %942 = vrot.lane.b32.xlu0 %v920_v33, %s1765_s13 }
 0x421   : > { %930 = vrot.lane.b32.xlu1 %v916_v9, %s1765_s13 }
 0x423   : > { %1132 = vrot.lane.b32.xlu0 %v1110_v16, %s1765_s13 }
 0x425   : > { %1120 = vrot.lane.b32.xlu1 %v1106_v34, %s1765_s13 }
 0x481   : > { %v1125_v35 = vpop.permute.xlu0 %1124 }
 0x482   : > { %v1138_v50 = vsel %vm592_vm4, %v1107_v15, %v1125_v35 }
 0x483   : > { %v1113_v36 = vpop.permute.xlu1 %1112 }
 0x484   : > { %v1135_v51 = vsel %vm592_vm4, %v1103_v17, %v1113_v36 }
 0x485   : > { %v1129_v37 = vpop.permute.xlu0 %1128 }
 0x486   : > { %v1139_v52 = vsel %vm946_vm6, %v1138_v50, %v1129_v37 }
 0x487   : > { %v1117_v38 = vpop.permute.xlu1 %1116 }
 0x489   : > { %v935_v8 = vpop.permute.xlu0 %934 }
 0x48a   : > { %v950_v42 = vsel %vm592_vm4, %v917_v20, %v935_v8 }
 0x48b   : > { %v923_v39 = vpop.permute.xlu1 %922 }
 0x48c   : > { %v945_v43 = vsel %vm592_vm4, %v913_v21, %v923_v39 }
 0x48d   : > { %v939_v40 = vpop.permute.xlu0 %938 }
 0x48e   : > { %v951_v44 = vsel %vm946_vm6, %v950_v42, %v939_v40 }
 0x48f   : > { %v927_v41 = vpop.permute.xlu1 %926 }
 0x490   : > { %v947_v46 = vsel %vm946_vm6, %v945_v43, %v927_v41 }
 0x491   : > { %v943_v45 = vpop.permute.xlu0 %942 }
 0x492   : > { %v952_v47 = vsel %vm948_vm5, %v951_v44, %v943_v45 }
 0x493   : > { %v931_v48 = vpop.permute.xlu1 %930  ;;  %954 = vst [vmem:[%s353_s10 + $0x8] sm:$0xff] %v952_v47 }
 0x494   : > { %v949_v49 = vsel %vm948_vm5, %v947_v46, %v931_v48 }
 0x495   : > { %953 = vst [vmem:[%s353_s10] sm:$0xff] %v949_v49  ;;  %v1133_v53 = vpop.permute.xlu0 %1132 }
 0x496   : > { %1639 = shalt.err (!%p1636_p1)
}
 0x497   : > { %s1640_s18 = scalar_lea.hbm %s2073_s19, 256  ;;  %s1644_s21 = scalar_lea.hbm %s2176_s5, 512 }
 0x498   : > { %p1641_p2 = scmp.ne.s32.totalorder %s2073_s19, %s1640_s18  ;;  %p1645_p11 = scmp.lt.s32.totalorder %s2073_s19, %s2176_s5 }
 0x499   : > { %p1646_p0 = scmp.lt.s32.totalorder %s1644_s21, %s1640_s18 }
 0x49a   : > { %p1642_p6 = pnand %p1641_p2, %p1897_p9 }
 0x49b   : > { %p1647_p12 = por %p1646_p0, %p1645_p11 }
 0x49c   : > { %p1643_p8 = pneg %p1642_p6 }
 0x49e   : > { %p1648_p4 = pnand %p1647_p12, %p1643_p8 }
 0x4a0   : > { %1651 = shalt.err (!%p1648_p4)
}
 0x4a1   : > { %1424 = dma.vmem_to_hbm [thread:$0]  (%p1897_p9), %s2075_s0, 256, %s2073_s19, %s1144_s2   ;;  %v1136_v54 = vsel %vm946_vm6, %v1135_v51, %v1117_v38  ;;  %v1140_v55 = vsel %vm948_vm5, %v1139_v52, %v1133_v53  ;;  %v1121_v56 = vpop.permute.xlu1 %1120 }
 0x4a2   : > { %s2118_s28 = scalar_lea.hbm %s2177_s6, %s1370_s15  ;;  %1142 = vst [vmem:[%s2078_s29 + $0x8] sm:$0xff] %v1140_v55  ;;  %v1137_v57 = vsel %vm948_vm5, %v1136_v54, %v1121_v56  ;;  %s1149_s0 = scalar_lea.sflag [#allocation14], %s1939_s12 }
 0x4a3   : > { %1141 = vst [vmem:[%s2078_s29] sm:$0xff] %v1137_v57  ;;  %s1652_s19 = scalar_lea.vmem %s2122_s1, 256  ;;  %s1767_s26 = smov [#allocation13]  }
 0x4a4   : > { %p1653_p3 = scmp.ne.s32.totalorder %s2122_s1, %s1652_s19  ;;  %s1656_s2 = sshll.u32 %s1767_s26, 4  ;;  %s1657_s2 = int_to_ptr.vmem [resolvable:$false] %s1656_s2 }
 0x4a5   : > { %s1658_s15 = scalar_lea.vmem %s1657_s2, 512  ;;  %p1659_p5 = scmp.lt.s32.totalorder %s2122_s1, %s1657_s2 }
 0x4a6   : > { %p1654_p7 = pnand %p1653_p3, %p1897_p9  ;;  %p1660_p10 = scmp.lt.s32.totalorder %s1658_s15, %s1652_s19 }
 0x4a8   : > { %p1655_p13 = pneg %p1654_p7  ;;  %p1661_p1 = por %p1660_p10, %p1659_p5 }
 0x4aa   : > { %p1662_p2 = pnand %p1661_p1, %p1655_p13 }
 0x4ac   : > { %1665 = shalt.err (!%p1662_p2)
}
 0x4ad   : > { %s1666_s29 = scalar_lea.hbm %s2118_s28, 256  ;;  %s1670_s20 = scalar_lea.hbm %s2177_s6, 512 }
 0x4ae   : > { %p1667_p6 = scmp.ne.s32.totalorder %s2118_s28, %s1666_s29  ;;  %p1671_p0 = scmp.lt.s32.totalorder %s2118_s28, %s2177_s6 }
 0x4af   : > { %p1672_p12 = scmp.lt.s32.totalorder %s1670_s20, %s1666_s29 }
 0x4b0   : > { %p1668_p8 = pnand %p1667_p6, %p1897_p9 }
 0x4b1   : > { %p1673_p4 = por %p1672_p12, %p1671_p0 }
 0x4b2   : > { %p1669_p11 = pneg %p1668_p8 }
 0x4b4   : > { %p1674_p3 = pnand %p1673_p4, %p1669_p11 }
 0x4b6   : > { %1677 = shalt.err (!%p1674_p3)
}
 0x4b7   : > { %1425 = dma.vmem_to_hbm [thread:$0]  (%p1897_p9), %s2122_s1, 256, %s2118_s28, %s1149_s0  }
 0x4b8 PF: > { %s1193_s13 = sand.u32 1, %s1728_s23   ;;  %p2196_p7 = scmp.ne.s32.totalorder %s2183_s7, 0 }
 0x4b9   : > { %p2197_p13 = scmp.ge.s32.totalorder %s1748_s4, 2  ;;  %s1194_s21 = scalar_lea.sflag [#allocation6], %s1193_s13 }
 0x4bb   : > { %p1443_p5 = pnand %p2197_p13, %p2196_p7 }
 0x4bd   : > { %p1444_p10 = pneg %p1443_p5 }
 0x4bf   : > { %1719 = dma.done.wait (%p1444_p10), %s1194_s21, 256  }
 0x4c0   : > { %1721 = vsyncadd (%p1444_p10), %s1194_s21, 4294967040  ;;  %s1203_s10 = scalar_lea.sflag [#allocation14], %s1193_s13 }
 0x4c1   : > { %1723 = dma.done.wait (%p1444_p10), %s1203_s10, 256  }
 0x4c2   : > { %1725 = vsyncadd (%p1444_p10), %s1203_s10, 4294967040  ;;  %s31_s4 = sadd.s32 1, %s1748_s4   ;;  %s2198_s23 = smov %s1732_s24 }
 0x4c3   : > { %p28_p1 = scmp.ge.s32.totalorder %s31_s4, 4   ;;  %s2199_s24 = smov %s1736_s25 }
 0x4c4   : > { %s2200_s25 = smov %s1906_s14  ;;  %s2201_s26 = smov %s1744_s27 }
 0x4c5   : > { %s2202_s27 = smov %s2204_s22  ;;  %30 = sbr.rel (!%p28_p1) target bundleno = 16 (0x10), region = 124 }
 0x4ca   :  { %1208 = vsyncpa [#allocation5], 1 }
 0x4cb   :  { %1210 = vsyncpa [#allocation5 + $0x1], 1 }
 0x4cc   :  { %1211 = vsyncpa [#allocation8], 1 }
 0x4cd   :  { %1213 = vsyncpa [#allocation8 + $0x1], 1 }
 0x4ce   :  { %1214 = vsyncpa [#allocation11], 1 }
 0x4cf   :  { %1215 = vsyncpa [#allocation6], 1 }
 0x4d0   :  { %1217 = vsyncpa [#allocation6 + $0x1], 1 }
 0x4d1   :  { %1218 = vsyncpa [#allocation14], 1 }
 0x4d2   :  { %1220 = vsyncpa [#allocation14 + $0x1], 1 }

</bundles_post_ra>
